<compile_context>
chip_gen: v5e
topology: v5e:2x2
jax: 0.10.0
libtpu: 0.0.40
codegen_flags: <defaults>
</compile_context>

<pallas_src>
import functools

import jax
import jax.numpy as jnp
from jax.experimental import pallas as pl
from jax.experimental.pallas import tpu as pltpu

HIDDEN = 100          # logical hidden width (PyTorch spec)
HPAD = 128            # lane-aligned hidden width
LANE = 128
SUBLANE = 8


def _round_up(x, m):
    return ((x + m - 1) // m) * m


def mlp_kernel(x_ref, w1_ref, b1_ref, w2_ref, b2_ref, w3_ref, b3_ref, o_ref):
    # Layer 1: bf16 MXU matmul, f32 accumulate, f32 epilogue (bias + ReLU).
    h1 = jnp.dot(x_ref[...], w1_ref[...], preferred_element_type=jnp.float32)
    h1 = jnp.maximum(h1 + b1_ref[...], 0.0)
    # Layer 2.
    h2 = jnp.dot(h1.astype(w2_ref.dtype), w2_ref[...],
                 preferred_element_type=jnp.float32)
    h2 = jnp.maximum(h2 + b2_ref[...], 0.0)
    # Output layer (no activation); lane-dense padded store.
    out = jnp.dot(h2.astype(w3_ref.dtype), w3_ref[...],
                  preferred_element_type=jnp.float32)
    o_ref[...] = (out + b3_ref[...]).astype(o_ref.dtype)


def init_params(key, input_dimension, output_dimension, hidden=HIDDEN):
    """Params with hidden/output padded to 128 lanes (zero-filled padding).

    Zero padding is inert: padded h columns are ReLU(0)=0 and the padded rows
    of the next weight are zero, so logical outputs are unchanged.
    """
    k1, k2, k3, k4, k5, k6 = jax.random.split(key, 6)
    scale = 0.1
    hpad = _round_up(hidden, LANE)
    opad = _round_up(output_dimension, LANE)

    def padded(k, shape, full_shape):
        w = scale * jax.random.normal(k, shape, jnp.float32)
        return jnp.zeros(full_shape, jnp.float32).at[: shape[0], : shape[1]].set(w)

    return {
        "w1": padded(k1, (input_dimension, hidden), (input_dimension, hpad)),
        "b1": padded(k2, (1, hidden), (1, hpad)),
        "w2": padded(k3, (hidden, hidden), (hpad, hpad)),
        "b2": padded(k4, (1, hidden), (1, hpad)),
        "w3": padded(k5, (hidden, output_dimension), (hpad, opad)),
        "b3": padded(k6, (1, output_dimension), (1, opad)),
    }


@functools.partial(jax.jit, static_argnames=("output_dimension", "block_batch"))
def network_forward(x, params, output_dimension, block_batch=512):
    """Run the fused MLP Pallas kernel.  x: (batch, input_dimension) f32."""
    w1, b1 = params["w1"], params["b1"]
    w2, b2 = params["w2"], params["b2"]
    w3, b3 = params["w3"], params["b3"]

    batch, in_dim = x.shape
    hpad = w1.shape[1]
    opad = w3.shape[1]

    # Batch tile: multiple of 8 sublanes, capped at block_batch.
    tb = min(block_batch, _round_up(batch, SUBLANE))
    batch_pad = _round_up(batch, tb)
    grid = (pl.cdiv(batch_pad, tb),)

    # Cast matmul operands to bf16 (biases stay f32 for the epilogue).
    x_p = jnp.zeros((batch_pad, in_dim), jnp.bfloat16)
    x_p = x_p.at[:batch, :].set(x.astype(jnp.bfloat16))
    w1b = w1.astype(jnp.bfloat16)
    w2b = w2.astype(jnp.bfloat16)
    w3b = w3.astype(jnp.bfloat16)

    flops = 2 * batch_pad * (in_dim * hpad + hpad * hpad + hpad * opad)
    bytes_accessed = (
        x_p.size * 2 + w1b.size * 2 + w2b.size * 2 + w3b.size * 2
        + (b1.size + b2.size + b3.size) * 4 + batch_pad * opad * 4
    )

    resident = lambda shape: pl.BlockSpec(shape, lambda i: (0, 0))

    out_padded = pl.pallas_call(
        mlp_kernel,
        out_shape=jax.ShapeDtypeStruct((batch_pad, opad), jnp.float32),
        grid=grid,
        in_specs=[
            pl.BlockSpec((tb, in_dim), lambda i: (i, 0)),   # x: tiled over batch
            resident(w1b.shape), resident(b1.shape),        # weights/biases: VMEM-resident
            resident(w2b.shape), resident(b2.shape),
            resident(w3b.shape), resident(b3.shape),
        ],
        out_specs=pl.BlockSpec((tb, opad), lambda i: (i, 0)),
        compiler_params=pltpu.CompilerParams(
            dimension_semantics=("parallel",)),             # v7x: 2 TCs split the batch
        cost_estimate=pl.CostEstimate(
            flops=flops, transcendentals=0, bytes_accessed=bytes_accessed),
    )(x_p, w1b, b1, w2b, b2, w3b, b3)

    # Slice off batch padding and the lane padding of the output layer.
    return out_padded[:batch, :output_dimension]


def _reference(x, params, output_dimension):
    """Pure-JAX reference with the same bf16-operand / f32-accumulate numerics."""
    xb = x.astype(jnp.bfloat16)
    w1 = params["w1"].astype(jnp.bfloat16)
    w2 = params["w2"].astype(jnp.bfloat16)
    w3 = params["w3"].astype(jnp.bfloat16)
    h1 = jnp.maximum(
        jnp.dot(xb, w1, preferred_element_type=jnp.float32) + params["b1"], 0.0)
    h2 = jnp.maximum(
        jnp.dot(h1.astype(jnp.bfloat16), w2, preferred_element_type=jnp.float32)
        + params["b2"], 0.0)
    out = (jnp.dot(h2.astype(jnp.bfloat16), w3, preferred_element_type=jnp.float32)
           + params["b3"])
    return out[:, :output_dimension]


if __name__ == "__main__":
    key = jax.random.PRNGKey(0)
    kx, kp = jax.random.split(key)

    input_dimension = 8
    output_dimension = 4
    batch = 8

    x = jax.random.normal(kx, (batch, input_dimension), jnp.float32)
    params = init_params(kp, input_dimension, output_dimension)

    out = network_forward(x, params, output_dimension)
    out = jax.block_until_ready(out)

    ref = _reference(x, params, output_dimension)
    assert out.shape == (batch, output_dimension)
    assert jnp.allclose(out, ref, atol=2e-3, rtol=2e-3)

    print("KERNEL_OK")
</pallas_src>

<mosaic_0001>
module attributes {stable_mosaic.version = 11 : i64} {
  func.func @mlp_kernel(%arg0: i32, %arg1: memref<8x8xbf16, #tpu.memory_space<vmem>>, %arg2: memref<8x128xbf16, #tpu.memory_space<vmem>>, %arg3: memref<1x128xf32, #tpu.memory_space<vmem>>, %arg4: memref<128x128xbf16, #tpu.memory_space<vmem>>, %arg5: memref<1x128xf32, #tpu.memory_space<vmem>>, %arg6: memref<128x128xbf16, #tpu.memory_space<vmem>>, %arg7: memref<1x128xf32, #tpu.memory_space<vmem>>, %arg8: memref<8x128xf32, #tpu.memory_space<vmem>>) attributes {dimension_semantics = [#tpu.dimension_semantics<parallel>], iteration_bounds = array<i64: 1>, scalar_prefetch = 0 : i64, scratch_operands = 0 : i64, tpu.core_type = #tpu.core_type<tc>, window_params = [{transform_indices = @transform_0, window_bounds = array<i64: 8, 8>}, {pipeline_mode = #tpu.pipeline_mode<synchronous>, transform_indices = @transform_1, window_bounds = array<i64: 8, 128>}, {pipeline_mode = #tpu.pipeline_mode<synchronous>, transform_indices = @transform_2, window_bounds = array<i64: 1, 128>}, {pipeline_mode = #tpu.pipeline_mode<synchronous>, transform_indices = @transform_3, window_bounds = array<i64: 128, 128>}, {pipeline_mode = #tpu.pipeline_mode<synchronous>, transform_indices = @transform_4, window_bounds = array<i64: 1, 128>}, {pipeline_mode = #tpu.pipeline_mode<synchronous>, transform_indices = @transform_5, window_bounds = array<i64: 128, 128>}, {pipeline_mode = #tpu.pipeline_mode<synchronous>, transform_indices = @transform_6, window_bounds = array<i64: 1, 128>}, {transform_indices = @transform_7, window_bounds = array<i64: 8, 128>}]} {
    %c0 = arith.constant 0 : index
    %c0_0 = arith.constant 0 : index
    %0 = vector.load %arg1[%c0, %c0_0] : memref<8x8xbf16, #tpu.memory_space<vmem>>, vector<8x8xbf16>
    %c0_1 = arith.constant 0 : index
    %c0_2 = arith.constant 0 : index
    %1 = vector.load %arg2[%c0_1, %c0_2] : memref<8x128xbf16, #tpu.memory_space<vmem>>, vector<8x128xbf16>
    %cst = arith.constant dense<0.000000e+00> : vector<8x128xf32>
    %2 = tpu.matmul %0, %1, %cst {dimension_numbers = #tpu.dot_dimension_numbers<[1], [0], [0], [1], [0, 0, 1, 1], [], []>} : vector<8x8xbf16>, vector<8x128xbf16>, vector<8x128xf32> -> vector<8x128xf32>
    %c0_3 = arith.constant 0 : index
    %c0_4 = arith.constant 0 : index
    %3 = vector.load %arg3[%c0_3, %c0_4] : memref<1x128xf32, #tpu.memory_space<vmem>>, vector<1x128xf32>
    %4 = vector.broadcast %3 : vector<1x128xf32> to vector<8x128xf32>
    %5 = arith.addf %2, %4 : vector<8x128xf32>
    %cst_5 = arith.constant 0.000000e+00 : f32
    %6 = vector.broadcast %cst_5 : f32 to vector<8x128xf32>
    %7 = arith.maximumf %5, %6 : vector<8x128xf32>
    %8 = arith.truncf %7 : vector<8x128xf32> to vector<8x128xbf16>
    %c0_6 = arith.constant 0 : index
    %c0_7 = arith.constant 0 : index
    %9 = vector.load %arg4[%c0_6, %c0_7] : memref<128x128xbf16, #tpu.memory_space<vmem>>, vector<128x128xbf16>
    %cst_8 = arith.constant dense<0.000000e+00> : vector<8x128xf32>
    %10 = tpu.matmul %8, %9, %cst_8 {dimension_numbers = #tpu.dot_dimension_numbers<[1], [0], [0], [1], [0, 0, 1, 1], [], []>} : vector<8x128xbf16>, vector<128x128xbf16>, vector<8x128xf32> -> vector<8x128xf32>
    %c0_9 = arith.constant 0 : index
    %c0_10 = arith.constant 0 : index
    %11 = vector.load %arg5[%c0_9, %c0_10] : memref<1x128xf32, #tpu.memory_space<vmem>>, vector<1x128xf32>
    %12 = vector.broadcast %11 : vector<1x128xf32> to vector<8x128xf32>
    %13 = arith.addf %10, %12 : vector<8x128xf32>
    %cst_11 = arith.constant 0.000000e+00 : f32
    %14 = vector.broadcast %cst_11 : f32 to vector<8x128xf32>
    %15 = arith.maximumf %13, %14 : vector<8x128xf32>
    %16 = arith.truncf %15 : vector<8x128xf32> to vector<8x128xbf16>
    %c0_12 = arith.constant 0 : index
    %c0_13 = arith.constant 0 : index
    %17 = vector.load %arg6[%c0_12, %c0_13] : memref<128x128xbf16, #tpu.memory_space<vmem>>, vector<128x128xbf16>
    %cst_14 = arith.constant dense<0.000000e+00> : vector<8x128xf32>
    %18 = tpu.matmul %16, %17, %cst_14 {dimension_numbers = #tpu.dot_dimension_numbers<[1], [0], [0], [1], [0, 0, 1, 1], [], []>} : vector<8x128xbf16>, vector<128x128xbf16>, vector<8x128xf32> -> vector<8x128xf32>
    %c0_15 = arith.constant 0 : index
    %c0_16 = arith.constant 0 : index
    %19 = vector.load %arg7[%c0_15, %c0_16] : memref<1x128xf32, #tpu.memory_space<vmem>>, vector<1x128xf32>
    %20 = vector.broadcast %19 : vector<1x128xf32> to vector<8x128xf32>
    %21 = arith.addf %18, %20 : vector<8x128xf32>
    %c0_17 = arith.constant 0 : index
    %c0_18 = arith.constant 0 : index
    %22 = vector.load %arg8[%c0_17, %c0_18] : memref<8x128xf32, #tpu.memory_space<vmem>>, vector<8x128xf32>
    tpu.vector_store %arg8[%c0_17, %c0_18], %21 {strides = array<i32>} : memref<8x128xf32, #tpu.memory_space<vmem>>, vector<8x128xf32>,
    return
  }
  func.func @transform_0(%arg0: i32) -> (i32, i32) {
    %c0_i32 = arith.constant 0 : i32
    %c0_i32_0 = arith.constant 0 : i32
    return %arg0, %c0_i32 : i32, i32
  }
  func.func @transform_1(%arg0: i32) -> (i32, i32) {
    %c0_i32 = arith.constant 0 : i32
    %c0_i32_0 = arith.constant 0 : i32
    %c0_i32_1 = arith.constant 0 : i32
    return %c0_i32, %c0_i32_0 : i32, i32
  }
  func.func @transform_2(%arg0: i32) -> (i32, i32) {
    %c0_i32 = arith.constant 0 : i32
    %c0_i32_0 = arith.constant 0 : i32
    %c0_i32_1 = arith.constant 0 : i32
    return %c0_i32, %c0_i32_0 : i32, i32
  }
  func.func @transform_3(%arg0: i32) -> (i32, i32) {
    %c0_i32 = arith.constant 0 : i32
    %c0_i32_0 = arith.constant 0 : i32
    %c0_i32_1 = arith.constant 0 : i32
    return %c0_i32, %c0_i32_0 : i32, i32
  }
  func.func @transform_4(%arg0: i32) -> (i32, i32) {
    %c0_i32 = arith.constant 0 : i32
    %c0_i32_0 = arith.constant 0 : i32
    %c0_i32_1 = arith.constant 0 : i32
    return %c0_i32, %c0_i32_0 : i32, i32
  }
  func.func @transform_5(%arg0: i32) -> (i32, i32) {
    %c0_i32 = arith.constant 0 : i32
    %c0_i32_0 = arith.constant 0 : i32
    %c0_i32_1 = arith.constant 0 : i32
    return %c0_i32, %c0_i32_0 : i32, i32
  }
  func.func @transform_6(%arg0: i32) -> (i32, i32) {
    %c0_i32 = arith.constant 0 : i32
    %c0_i32_0 = arith.constant 0 : i32
    %c0_i32_1 = arith.constant 0 : i32
    return %c0_i32, %c0_i32_0 : i32, i32
  }
  func.func @transform_7(%arg0: i32) -> (i32, i32) {
    %c0_i32 = arith.constant 0 : i32
    %c0_i32_0 = arith.constant 0 : i32
    return %arg0, %c0_i32 : i32, i32
  }
}

</mosaic_0001>

<bundles_post_ra>
// kernel: network_forward.1
= control target key start
LH: loop header
LB: loop body
LE: loop exit
PB: predicated region body
PF: predicated region fallthrough
CT: control target
= control target key end

     0   :  { %vm37_vm0 = vcmask 1043456   ;;  %vm33_vm1 = vcmask 64512   ;;  %s415_s1 = inlined_call_operand.vmem [shape: bf16[8,128], index: 1, kind: input, shape index: {}]   ;;  %s416_s0 = inlined_call_operand.vmem [shape: bf16[8,8], index: 0, kind: input, shape index: {}]   ;;  %s417_s3 = inlined_call_operand.vmem [shape: bf16[128,128], index: 3, kind: input, shape index: {}]   ;;  %s418_s2 = inlined_call_operand.vmem [shape: f32[1,128], index: 2, kind: input, shape index: {}]   ;;  %s419_s4 = inlined_call_operand.vmem [shape: f32[1,128], index: 4, kind: input, shape index: {}]   ;;  %s420_s5 = inlined_call_operand.vmem [shape: bf16[128,128], index: 5, kind: input, shape index: {}]   ;;  %s421_s6 = inlined_call_operand.vmem [shape: f32[1,128], index: 6, kind: input, shape index: {}]   ;;  %s422_s7 = inlined_call_operand.vmem [shape: f32[8,128], index: 7, kind: output, shape index: {}]  }
   0x1   :  { %v28_v0 = vld [vmem:[%s415_s1] sm:$0xf]  ;;  %v297_v1 = vld [vmem:[%s417_s3 + $0x38] sm:$0xff]  ;;  %v296_v4 = vld [vmem:[%s417_s3 + $0x30] sm:$0xff] }
   0x2   :  { %v39_v2 = vsel %vm37_vm0, %v28_v0, 0  ;;  %v27_v3 = vld [vmem:[%s416_s0] sm:$0xf]  ;;  %124 = vmatpush.bf16.msra.mxu1 %v297_v1  ;;  %v295_v5 = vld [vmem:[%s417_s3 + $0x28] sm:$0xff]  ;;  %v293_v7 = vld [vmem:[%s417_s3 + $0x18] sm:$0xff] }
   0x3   :  { %48 = vmatpush.bf16.msra.mxu0 %v39_v2  ;;  %v294_v6 = vld [vmem:[%s417_s3 + $0x20] sm:$0xff]  ;;  %v292_v8 = vld [vmem:[%s417_s3 + $0x10] sm:$0xff]  ;;  %v291_v9 = vld [vmem:[%s417_s3 + $0x8] sm:$0xff] }
   0x4   :  { %v290_v10 = vld [vmem:[%s417_s3] sm:$0xff]  ;;  %v305_v11 = vld [vmem:[%s420_s5 + $0x38] sm:$0xff]  ;;  %v304_v12 = vld [vmem:[%s420_s5 + $0x30] sm:$0xff] }
   0x5   :  { %207 = vmatpush.bf16.msra.mxu2 %v305_v11  ;;  %v303_v13 = vld [vmem:[%s420_s5 + $0x28] sm:$0xff]  ;;  %v302_v14 = vld [vmem:[%s420_s5 + $0x20] sm:$0xff]  ;;  %v301_v15 = vld [vmem:[%s420_s5 + $0x18] sm:$0xff] }
   0x6   :  { %225 = vmatmul.msk.bf16.vlgmr.msra.gmra.mxu0 %vm33_vm1, %v27_v3  ;;  %125 = vmatpush.bf16.msra.mxu1 %v296_v4  ;;  %v300_v16 = vld [vmem:[%s420_s5 + $0x10] sm:$0xff]  ;;  %v306_v17 = vld [vmem:[%s418_s2] ss:$0 sm:$0xff]  ;;  %v299_v23 = vld [vmem:[%s420_s5 + $0x8] sm:$0xff] }
   0x7   :  { %v298_v24 = vld [vmem:[%s420_s5] sm:$0xff] }
   0x8   :  { %v307_v25 = vld [vmem:[%s419_s4] ss:$0 sm:$0xff] }
   0x9   :  { %208 = vmatpush.bf16.msra.mxu2 %v304_v12  ;;  %v308_v31 = vld [vmem:[%s421_s6] ss:$0 sm:$0xff] }
   0xa   :  { %126 = vmatpush.bf16.msra.mxu1 %v295_v5 }
   0xd   :  { %209 = vmatpush.bf16.msra.mxu2 %v303_v13 }
   0xe   :  { %127 = vmatpush.bf16.msra.mxu1 %v294_v6 }
  0x11   :  { %210 = vmatpush.bf16.msra.mxu2 %v302_v14 }
  0x12   :  { %128 = vmatpush.bf16.msra.mxu1 %v293_v7 }
  0x15   :  { %211 = vmatpush.bf16.msra.mxu2 %v301_v15 }
  0x16   :  { %129 = vmatpush.bf16.msra.mxu1 %v292_v8 }
  0x19   :  { %212 = vmatpush.bf16.msra.mxu2 %v300_v16 }
  0x1a   :  { %130 = vmatpush.bf16.msra.mxu1 %v291_v9 }
  0x1d   :  { %213 = vmatpush.bf16.msra.mxu2 %v299_v23 }
  0x1e   :  { %131 = vmatpush.bf16.msra.mxu1 %v290_v10 }
  0x21   :  { %214 = vmatpush.bf16.msra.mxu2 %v298_v24 }
  0x83   :  { %v50_v18 = vpop.f32.mrf.mxu0 }
  0x84   :  { %v51_v19 = vadd.f32 %v306_v17, %v50_v18 }
  0x86   :  { %v54_v20 = vmax.f32 %v51_v19, 0.0 }
  0x88   :  { %v55_v21 = vpack.c.bf16 %v54_v20, %v54_v20 }
  0x8a   :  { %132 = vmatmul.bf16.vlgmr.msra.gmra.mxu1 %v55_v21 }
  0x8b   :  { %v52_v22 = vpop.f32.mrf.mxu0 }
 0x107   :  { %v133_v26 = vpop.f32.mrf.mxu1 }
 0x108   :  { %v134_v27 = vadd.f32 %v307_v25, %v133_v26 }
 0x10a   :  { %v137_v28 = vmax.f32 %v134_v27, 0.0 }
 0x10c   :  { %v138_v29 = vpack.c.bf16 %v137_v28, %v137_v28 }
 0x10e   :  { %215 = vmatmul.bf16.vlgmr.msra.gmra.mxu2 %v138_v29 }
 0x10f   :  { %v135_v30 = vpop.f32.mrf.mxu1 }
 0x191   :  { %v216_v32 = vpop.f32.mrf.mxu2 }
 0x192   :  { %v217_v33 = vadd.f32 %v308_v31, %v216_v32 }
 0x194   :  { %220 = vst [vmem:[%s422_s7] sm:$0xff] %v217_v33 }
 0x199   :  { %v218_v34 = vpop.f32.mrf.mxu2 }

</bundles_post_ra>
